<compile_context>
chip_gen: v6e
topology: v6e:2x2x1
jax: 0.10.0
libtpu: 0.0.40
codegen_flags: <defaults>
</compile_context>

<pallas_src>
import functools
import math

import jax
import jax.numpy as jnp
from jax.experimental import pallas as pl
from jax.experimental.pallas import tpu as pltpu

_EPS = 1e-5                      # BatchNorm1d default eps
_ACT_DTYPE = jnp.bfloat16        # HBM storage dtype for activations and block I/O
_TM_CANDIDATES = (2048, 1024, 512, 256, 128, 64, 32, 16, 8)


def _round_up(x, n):
    return -(-x // n) * n


def _vmem_budget_bytes():
    """Scoped-VMEM budget derived from the physical VMEM of this generation."""
    try:
        phys = int(pltpu.get_tpu_info().vmem_capacity_bytes)
    except Exception:
        phys = 64 << 20          # v7x-safe fallback (smallest physical VMEM)
    # Use ~60% of physical, clamped to a sane window (v7x: ~38 MiB, v5e/v6e: ~77 MiB).
    return int(min(max((phys * 3) // 5, 32 << 20), 100 << 20))


def _choose_m_tiling(m_true, n_splits, tm_cap):
    """Pick (tile_m, padded_M): prefer exact divisors, else pad with bounded waste."""
    cands = [t for t in _TM_CANDIDATES if t <= tm_cap] or [8]
    for t in cands:                                   # no-padding choice first
        if m_true % (t * n_splits) == 0:
            return t, m_true
    for t in cands:                                   # padded, bounded waste
        m_pad = _round_up(m_true, t * n_splits)
        if m_pad - m_true <= max(m_true // 8, 8 * n_splits):
            return t, m_pad
    t = cands[-1]
    return t, _round_up(m_true, t * n_splits)


# ---------------------------------------------------------------------------
# Kernel 1: [optional fused BN+relu6 of previous layer] -> 1x1 conv (matmul)
#           -> bf16 activation + per-core partial per-channel sum / sumsq.
# Grid: (n_splits [parallel, per-core], m_tiles [arbitrary, accumulating]).
# ---------------------------------------------------------------------------
def _conv_bn_stats_kernel(*refs, apply_pre_act, tm, m_tiles, m_true, m_pad):
    if apply_pre_act:
        a_ref, scale_ref, shift_ref, w_ref, h_ref, sum_ref, ssq_ref = refs
    else:
        a_ref, w_ref, h_ref, sum_ref, ssq_ref = refs
        scale_ref = shift_ref = None

    @pl.when(pl.program_id(1) == 0)
    def _init():
        sum_ref[...] = jnp.zeros_like(sum_ref)
        ssq_ref[...] = jnp.zeros_like(ssq_ref)

    a = a_ref[...].astype(jnp.float32)
    if apply_pre_act:
        # Previous layer's BatchNorm (precomputed scale/shift) + relu6, in f32.
        a = jnp.clip(a * scale_ref[...] + shift_ref[...], 0.0, 6.0)

    # 1x1 conv == channel matmul: bf16 operands, f32 MXU accumulation.
    y = jnp.dot(a.astype(jnp.bfloat16), w_ref[...],
                preferred_element_type=jnp.float32)

    # Padded rows must not contaminate the BN statistics.  For the first conv
    # (no pre-act) the padded input rows are exactly zero so y is already zero
    # there; for later layers the pre-act shift makes them nonzero -> mask.
    if apply_pre_act and (m_pad != m_true):
        row0 = (pl.program_id(0) * m_tiles + pl.program_id(1)) * tm
        rows = row0 + jax.lax.broadcasted_iota(jnp.int32, (tm, 1), 0)
        y = jnp.where(rows < m_true, y, 0.0)

    h_ref[...] = y.astype(h_ref.dtype)          # bf16 activation storage

    # Single-pass moments accumulated in f32, straight from the f32 matmul
    # result (no bf16 round-trip).
    # TODO(synk): if VALU saturates on v5e wide layers, move the column sum to
    # the MXU via a ones-row matmul.
    sum_ref[...] += jnp.sum(y, axis=0, keepdims=True)[None]
    ssq_ref[...] += jnp.sum(y * y, axis=0, keepdims=True)[None]


def _conv_bn_stats(a, w_bf16, scale, shift, *, tm, n_splits, m_true, vmem_limit):
    m_pad, c_in = a.shape
    c_out = w_bf16.shape[1]
    m_tiles = m_pad // (tm * n_splits)
    apply_pre_act = scale is not None

    def act_map(s, i):
        return (s * m_tiles + i, 0)

    inputs = [a]
    in_specs = [pl.BlockSpec((tm, c_in), act_map)]
    if apply_pre_act:
        inputs += [scale, shift]
        in_specs += [pl.BlockSpec((1, c_in), lambda s, i: (0, 0)),
                     pl.BlockSpec((1, c_in), lambda s, i: (0, 0))]
    inputs.append(w_bf16)
    in_specs.append(pl.BlockSpec((c_in, c_out), lambda s, i: (0, 0)))

    out_shape = (
        jax.ShapeDtypeStruct((m_pad, c_out), _ACT_DTYPE),
        jax.ShapeDtypeStruct((n_splits, 1, c_out), jnp.float32),   # partial sums
        jax.ShapeDtypeStruct((n_splits, 1, c_out), jnp.float32),   # partial sumsq
    )
    out_specs = (
        # TODO(synk): if xprof shows exposed DMA on this stream, sweep
        # pipeline_mode=pl.Buffered(3) on the activation in/out specs.
        pl.BlockSpec((tm, c_out), act_map),
        pl.BlockSpec((1, 1, c_out), lambda s, i: (s, 0, 0)),   # per-core resident acc
        pl.BlockSpec((1, 1, c_out), lambda s, i: (s, 0, 0)),   # per-core resident acc
    )

    kernel = functools.partial(
        _conv_bn_stats_kernel, apply_pre_act=apply_pre_act, tm=tm,
        m_tiles=m_tiles, m_true=m_true, m_pad=m_pad)

    return pl.pallas_call(
        kernel,
        out_shape=out_shape,
        grid=(n_splits, m_tiles),
        in_specs=in_specs,
        out_specs=out_specs,
        compiler_params=pltpu.CompilerParams(
            # Leading per-core split is parallel (v7x megacore); the inner M
            # axis revisits the resident stat accumulators -> arbitrary.
            dimension_semantics=("parallel", "arbitrary"),
            vmem_limit_bytes=int(vmem_limit),
        ),
    )(*inputs)


# ---------------------------------------------------------------------------
# Kernel 2: bn3 + relu6 -> identity residual add -> relu6 (bf16 output).
# ---------------------------------------------------------------------------
def _residual_kernel(h_ref, x_ref, scale_ref, shift_ref, o_ref):
    h = h_ref[...].astype(jnp.float32)
    z = jnp.clip(h * scale_ref[...] + shift_ref[...], 0.0, 6.0)   # bn3 + relu6
    x = x_ref[...].astype(jnp.float32)
    o_ref[...] = jnp.clip(z + x, 0.0, 6.0).astype(o_ref.dtype)    # +identity, relu6


def _bn_residual_relu6(h, x, scale, shift, *, tm, vmem_limit):
    m_pad, c = x.shape
    return pl.pallas_call(
        _residual_kernel,
        out_shape=jax.ShapeDtypeStruct((m_pad, c), _ACT_DTYPE),
        grid=(m_pad // tm,),
        in_specs=[
            pl.BlockSpec((tm, c), lambda i: (i, 0)),
            pl.BlockSpec((tm, c), lambda i: (i, 0)),
            pl.BlockSpec((1, c), lambda i: (0, 0)),
            pl.BlockSpec((1, c), lambda i: (0, 0)),
        ],
        out_specs=pl.BlockSpec((tm, c), lambda i: (i, 0)),
        compiler_params=pltpu.CompilerParams(
            dimension_semantics=("parallel",),      # independent M tiles
            vmem_limit_bytes=int(vmem_limit),
        ),
    )(h, x, scale, shift)


def _bn_scale_shift(s_parts, q_parts, m_rows, gamma, beta):
    """Training-mode BN (biased variance) folded into per-channel scale/shift.

    s_parts/q_parts are per-core partial sums of shape (n_splits, 1, C).
    """
    s = jnp.sum(s_parts, axis=0)
    q = jnp.sum(q_parts, axis=0)
    mean = s / m_rows
    # TODO(synk): single-pass var can lose precision for very large M (~1e6+
    # rows); switch to per-tile centered partials / chunked Welford merge then.
    var = jnp.maximum(q / m_rows - mean * mean, 0.0)
    scale = gamma * jax.lax.rsqrt(var + _EPS)
    shift = beta - mean * scale
    return scale, shift


@jax.jit
def block_forward(x_nlc, params):
    """Bottleneck Block forward. x_nlc: (N, L, C_in) channels-last; returns bf16 (N, L, C_in)."""
    n, length, c_in = x_nlc.shape
    m_true = n * length
    (w1, g1, be1, w2, g2, be2, w3, g3, be3) = params
    c_mid = w1.shape[1]
    assert w3.shape[1] == c_in, "identity residual needs in_channels == out_channels * 4"

    # Lane-dense channel padding (multiple of 128); no-op for real ResNet widths.
    c_in_pad = _round_up(c_in, 128)
    c_mid_pad = _round_up(c_mid, 128)

    # Generation-aware VMEM budget -> tile-M cap (double-buffered streamed blocks).
    budget = _vmem_budget_bytes()
    row_bytes = 2 * max(c_in_pad + c_mid_pad, 2 * c_mid_pad, 3 * c_in_pad)   # bf16 bytes/row
    resident = 2 * max(c_in_pad * c_mid_pad, c_mid_pad * c_mid_pad) \
        + 16 * (c_in_pad + c_mid_pad) + (1 << 20)
    tm_cap = max((budget - resident - (6 << 20)) // (2 * row_bytes), 8)
    n_splits = 2 if m_true >= 128 else 1          # per-core partial stats (v7x megacore)
    tm, m_pad = _choose_m_tiling(m_true, n_splits, tm_cap)

    # Block boundary: cast once to bf16, pad rows/channels (pads are no-ops
    # when already aligned, the common case).
    x2d = x_nlc.reshape(m_true, c_in).astype(_ACT_DTYPE)
    x2d = jnp.pad(x2d, ((0, m_pad - m_true), (0, c_in_pad - c_in)))

    def pad_w(w, cin_p, cout_p):
        cin, cout = w.shape
        return jnp.pad(w, ((0, cin_p - cin), (0, cout_p - cout))).astype(jnp.bfloat16)

    def pad_cvec(v, c_p):
        return jnp.pad(v, ((0, 0), (0, c_p - v.shape[1]))).astype(jnp.float32)

    w1p = pad_w(w1, c_in_pad, c_mid_pad)
    w2p = pad_w(w2, c_mid_pad, c_mid_pad)
    w3p = pad_w(w3, c_mid_pad, c_in_pad)
    g1p, b1p = pad_cvec(g1, c_mid_pad), pad_cvec(be1, c_mid_pad)
    g2p, b2p = pad_cvec(g2, c_mid_pad), pad_cvec(be2, c_mid_pad)
    g3p, b3p = pad_cvec(g3, c_in_pad), pad_cvec(be3, c_in_pad)

    mf = jnp.float32(m_true)
    kw = dict(tm=tm, n_splits=n_splits, m_true=m_true, vmem_limit=budget)

    h1, s1, q1 = _conv_bn_stats(x2d, w1p, None, None, **kw)     # conv1 + bn1 stats
    sc1, sh1 = _bn_scale_shift(s1, q1, mf, g1p, b1p)

    h2, s2, q2 = _conv_bn_stats(h1, w2p, sc1, sh1, **kw)        # bn1+relu6, conv2 + bn2 stats
    sc2, sh2 = _bn_scale_shift(s2, q2, mf, g2p, b2p)

    h3, s3, q3 = _conv_bn_stats(h2, w3p, sc2, sh2, **kw)        # bn2+relu6, conv3 + bn3 stats
    sc3, sh3 = _bn_scale_shift(s3, q3, mf, g3p, b3p)

    out2d = _bn_residual_relu6(h3, x2d, sc3, sh3, tm=tm, vmem_limit=budget)
    out2d = out2d[:m_true, :c_in]               # strip row/channel padding
    return out2d.reshape(n, length, c_in)


def init_params(key, in_channels, out_channels):
    """Conv1d weights stored as (C_in, C_out) so y = x @ W; BN gamma=1, beta=0.

    Conv biases are omitted: with training-mode BatchNorm right after each
    conv, a per-channel bias is cancelled exactly by the mean subtraction.
    """
    expansion = 4
    k1, k2, k3 = jax.random.split(key, 3)

    def conv_w(k, cin, cout):
        bound = 1.0 / math.sqrt(cin)        # PyTorch default uniform bound (k=1)
        return jax.random.uniform(k, (cin, cout), jnp.float32, -bound, bound)

    c_mid = out_channels
    c_out3 = out_channels * expansion

    w1 = conv_w(k1, in_channels, c_mid)
    g1, be1 = jnp.ones((1, c_mid), jnp.float32), jnp.zeros((1, c_mid), jnp.float32)
    w2 = conv_w(k2, c_mid, c_mid)
    g2, be2 = jnp.ones((1, c_mid), jnp.float32), jnp.zeros((1, c_mid), jnp.float32)
    w3 = conv_w(k3, c_mid, c_out3)
    g3, be3 = jnp.ones((1, c_out3), jnp.float32), jnp.zeros((1, c_out3), jnp.float32)

    return (w1, g1, be1, w2, g2, be2, w3, g3, be3)


def _reference_forward(x_nlc, params):
    """Pure-JAX reference mirroring the kernel's precision policy: bf16 I/O and
    activation storage, bf16 MXU operands, f32 stats taken from the f32 matmul
    result, training-mode BatchNorm."""
    n, length, c_in = x_nlc.shape
    x2d = x_nlc.reshape(n * length, c_in).astype(jnp.bfloat16)
    (w1, g1, be1, w2, g2, be2, w3, g3, be3) = params

    def conv_stats(a_bf16, w):
        y = jnp.dot(a_bf16, w.astype(jnp.bfloat16), preferred_element_type=jnp.float32)
        mean = jnp.mean(y, axis=0, keepdims=True)
        var = jnp.maximum(jnp.mean(y * y, axis=0, keepdims=True) - mean * mean, 0.0)
        return y.astype(_ACT_DTYPE), mean, var

    def bn_relu6(hb, mean, var, g, b):
        scale = g * jax.lax.rsqrt(var + _EPS)
        shift = b - mean * scale
        return jnp.clip(hb.astype(jnp.float32) * scale + shift, 0.0, 6.0)

    h1, m1, v1 = conv_stats(x2d, w1)
    a1 = bn_relu6(h1, m1, v1, g1, be1).astype(jnp.bfloat16)
    h2, m2, v2 = conv_stats(a1, w2)
    a2 = bn_relu6(h2, m2, v2, g2, be2).astype(jnp.bfloat16)
    h3, m3, v3 = conv_stats(a2, w3)
    z3 = bn_relu6(h3, m3, v3, g3, be3)
    out = jnp.clip(z3 + x2d.astype(jnp.float32), 0.0, 6.0).astype(_ACT_DTYPE)
    return out.reshape(n, length, c_in)


if __name__ == "__main__":
    # Small shapes consistent with the bottleneck: identity residual requires
    # in_channels == out_channels * 4.
    batch, out_channels, length = 2, 8, 16
    in_channels = out_channels * 4      # 32

    key = jax.random.PRNGKey(0)
    kx, kp = jax.random.split(key)
    # Channels-last (N, L, C_in) layout at the block boundary — no transposes.
    x = jax.random.normal(kx, (batch, length, in_channels), jnp.float32)
    params = init_params(kp, in_channels, out_channels)

    out = block_forward(x, params)
    jax.block_until_ready(out)

    ref = _reference_forward(x, params)
    assert out.shape == x.shape
    of = out.astype(jnp.float32)
    rf = ref.astype(jnp.float32)
    max_err = float(jnp.max(jnp.abs(of - rf)))
    mean_err = float(jnp.mean(jnp.abs(of - rf)))
    # bf16 output: allow one ulp at the relu6 ceiling on isolated elements,
    # require tight mean agreement.
    assert max_err <= 5e-2 and mean_err <= 2e-3, (
        f"max abs err {max_err}, mean abs err {mean_err}")

    print("KERNEL_OK")
</pallas_src>

<mosaic_0001>
module attributes {stable_mosaic.version = 11 : i64} {
  func.func @_conv_bn_stats_kernel(%arg0: i32, %arg1: i32, %arg2: memref<32x128xbf16, #tpu.memory_space<vmem>>, %arg3: memref<1x128xf32, #tpu.memory_space<vmem>>, %arg4: memref<1x128xf32, #tpu.memory_space<vmem>>, %arg5: memref<128x128xbf16, #tpu.memory_space<vmem>>, %arg6: memref<32x128xbf16, #tpu.memory_space<vmem>>, %arg7: memref<1x1x128xf32, #tpu.memory_space<vmem>>, %arg8: memref<1x1x128xf32, #tpu.memory_space<vmem>>) attributes {dimension_semantics = [#tpu.dimension_semantics<parallel>, #tpu.dimension_semantics<arbitrary>], iteration_bounds = array<i64: 1, 1>, scalar_prefetch = 0 : i64, scratch_operands = 0 : i64, tpu.core_type = #tpu.core_type<tc>, window_params = [{transform_indices = @transform_0, window_bounds = array<i64: 32, 128>}, {pipeline_mode = #tpu.pipeline_mode<synchronous>, transform_indices = @transform_1, window_bounds = array<i64: 1, 128>}, {pipeline_mode = #tpu.pipeline_mode<synchronous>, transform_indices = @transform_2, window_bounds = array<i64: 1, 128>}, {pipeline_mode = #tpu.pipeline_mode<synchronous>, transform_indices = @transform_3, window_bounds = array<i64: 128, 128>}, {transform_indices = @transform_4, window_bounds = array<i64: 32, 128>}, {transform_indices = @transform_5, window_bounds = array<i64: 1, 1, 128>}, {transform_indices = @transform_6, window_bounds = array<i64: 1, 1, 128>}]} {
    %c0_i32 = arith.constant 0 : i32
    %0 = arith.cmpi eq, %arg1, %c0_i32 : i32
    %1 = arith.extui %0 : i1 to i32
    %c0_i32_0 = arith.constant 0 : i32
    %2 = arith.cmpi ne, %1, %c0_i32_0 : i32
    scf.if %2 {
      %cst_26 = arith.constant 0.000000e+00 : f32
      %33 = vector.broadcast %cst_26 : f32 to vector<1x1x128xf32>
      %c0_27 = arith.constant 0 : index
      %c0_28 = arith.constant 0 : index
      %c0_29 = arith.constant 0 : index
      %34 = vector.load %arg7[%c0_27, %c0_28, %c0_29] : memref<1x1x128xf32, #tpu.memory_space<vmem>>, vector<1x1x128xf32>
      tpu.vector_store %arg7[%c0_27, %c0_28, %c0_29], %33 {strides = array<i32>} : memref<1x1x128xf32, #tpu.memory_space<vmem>>, vector<1x1x128xf32>,
      %cst_30 = arith.constant 0.000000e+00 : f32
      %35 = vector.broadcast %cst_30 : f32 to vector<1x1x128xf32>
      %c0_31 = arith.constant 0 : index
      %c0_32 = arith.constant 0 : index
      %c0_33 = arith.constant 0 : index
      %36 = vector.load %arg8[%c0_31, %c0_32, %c0_33] : memref<1x1x128xf32, #tpu.memory_space<vmem>>, vector<1x1x128xf32>
      tpu.vector_store %arg8[%c0_31, %c0_32, %c0_33], %35 {strides = array<i32>} : memref<1x1x128xf32, #tpu.memory_space<vmem>>, vector<1x1x128xf32>,
    } else {
    }
    %c0 = arith.constant 0 : index
    %c0_1 = arith.constant 0 : index
    %3 = vector.load %arg2[%c0, %c0_1] : memref<32x128xbf16, #tpu.memory_space<vmem>>, vector<32x128xbf16>
    %4 = arith.extf %3 : vector<32x128xbf16> to vector<32x128xf32>
    %c0_2 = arith.constant 0 : index
    %c0_3 = arith.constant 0 : index
    %5 = vector.load %arg3[%c0_2, %c0_3] : memref<1x128xf32, #tpu.memory_space<vmem>>, vector<1x128xf32>
    %6 = vector.broadcast %5 : vector<1x128xf32> to vector<32x128xf32>
    %7 = arith.mulf %4, %6 : vector<32x128xf32>
    %c0_4 = arith.constant 0 : index
    %c0_5 = arith.constant 0 : index
    %8 = vector.load %arg4[%c0_4, %c0_5] : memref<1x128xf32, #tpu.memory_space<vmem>>, vector<1x128xf32>
    %9 = vector.broadcast %8 : vector<1x128xf32> to vector<32x128xf32>
    %10 = arith.addf %7, %9 : vector<32x128xf32>
    %cst = arith.constant 0.000000e+00 : f32
    %cst_6 = arith.constant 6.000000e+00 : f32
    %11 = vector.broadcast %cst : f32 to vector<32x128xf32>
    %12 = arith.maximumf %11, %10 : vector<32x128xf32>
    %13 = vector.broadcast %cst_6 : f32 to vector<32x128xf32>
    %14 = arith.minimumf %13, %12 : vector<32x128xf32>
    %15 = arith.truncf %14 : vector<32x128xf32> to vector<32x128xbf16>
    %c0_7 = arith.constant 0 : index
    %c0_8 = arith.constant 0 : index
    %16 = vector.load %arg5[%c0_7, %c0_8] : memref<128x128xbf16, #tpu.memory_space<vmem>>, vector<128x128xbf16>
    %cst_9 = arith.constant dense<0.000000e+00> : vector<32x128xf32>
    %17 = tpu.matmul %15, %16, %cst_9 {dimension_numbers = #tpu.dot_dimension_numbers<[1], [0], [0], [1], [0, 0, 1, 1], [], []>} : vector<32x128xbf16>, vector<128x128xbf16>, vector<32x128xf32> -> vector<32x128xf32>
    %18 = arith.truncf %17 : vector<32x128xf32> to vector<32x128xbf16>
    %c0_10 = arith.constant 0 : index
    %c0_11 = arith.constant 0 : index
    %19 = vector.load %arg6[%c0_10, %c0_11] : memref<32x128xbf16, #tpu.memory_space<vmem>>, vector<32x128xbf16>
    tpu.vector_store %arg6[%c0_10, %c0_11], %18 {strides = array<i32>} : memref<32x128xbf16, #tpu.memory_space<vmem>>, vector<32x128xbf16>,
    %c0_12 = arith.constant 0 : index
    %c0_13 = arith.constant 0 : index
    %c0_14 = arith.constant 0 : index
    %20 = vector.load %arg7[%c0_12, %c0_13, %c0_14] : memref<1x1x128xf32, #tpu.memory_space<vmem>>, vector<1x1x128xf32>
    %cst_15 = arith.constant dense<0.000000e+00> : vector<128xf32>
    %21 = vector.multi_reduction <add>, %17, %cst_15 [0] : vector<32x128xf32> to vector<128xf32>
    %22 = vector.shape_cast %21 : vector<128xf32> to vector<1x128xf32>
    %23 = vector.shape_cast %22 : vector<1x128xf32> to vector<1x1x128xf32>
    %24 = arith.addf %20, %23 : vector<1x1x128xf32>
    %c0_16 = arith.constant 0 : index
    %c0_17 = arith.constant 0 : index
    %c0_18 = arith.constant 0 : index
    %25 = vector.load %arg7[%c0_16, %c0_17, %c0_18] : memref<1x1x128xf32, #tpu.memory_space<vmem>>, vector<1x1x128xf32>
    tpu.vector_store %arg7[%c0_16, %c0_17, %c0_18], %24 {strides = array<i32>} : memref<1x1x128xf32, #tpu.memory_space<vmem>>, vector<1x1x128xf32>,
    %c0_19 = arith.constant 0 : index
    %c0_20 = arith.constant 0 : index
    %c0_21 = arith.constant 0 : index
    %26 = vector.load %arg8[%c0_19, %c0_20, %c0_21] : memref<1x1x128xf32, #tpu.memory_space<vmem>>, vector<1x1x128xf32>
    %27 = arith.mulf %17, %17 : vector<32x128xf32>
    %cst_22 = arith.constant dense<0.000000e+00> : vector<128xf32>
    %28 = vector.multi_reduction <add>, %27, %cst_22 [0] : vector<32x128xf32> to vector<128xf32>
    %29 = vector.shape_cast %28 : vector<128xf32> to vector<1x128xf32>
    %30 = vector.shape_cast %29 : vector<1x128xf32> to vector<1x1x128xf32>
    %31 = arith.addf %26, %30 : vector<1x1x128xf32>
    %c0_23 = arith.constant 0 : index
    %c0_24 = arith.constant 0 : index
    %c0_25 = arith.constant 0 : index
    %32 = vector.load %arg8[%c0_23, %c0_24, %c0_25] : memref<1x1x128xf32, #tpu.memory_space<vmem>>, vector<1x1x128xf32>
    tpu.vector_store %arg8[%c0_23, %c0_24, %c0_25], %31 {strides = array<i32>} : memref<1x1x128xf32, #tpu.memory_space<vmem>>, vector<1x1x128xf32>,
    return
  }
  func.func @transform_0(%arg0: i32, %arg1: i32) -> (i32, i32) {
    %c1_i32 = arith.constant 1 : i32
    %0 = arith.muli %arg0, %c1_i32 : i32
    %1 = arith.addi %0, %arg1 : i32
    %c0_i32 = arith.constant 0 : i32
    %c0_i32_0 = arith.constant 0 : i32
    return %1, %c0_i32 : i32, i32
  }
  func.func @transform_1(%arg0: i32, %arg1: i32) -> (i32, i32) {
    %c0_i32 = arith.constant 0 : i32
    %c0_i32_0 = arith.constant 0 : i32
    %c0_i32_1 = arith.constant 0 : i32
    return %c0_i32, %c0_i32_0 : i32, i32
  }
  func.func @transform_2(%arg0: i32, %arg1: i32) -> (i32, i32) {
    %c0_i32 = arith.constant 0 : i32
    %c0_i32_0 = arith.constant 0 : i32
    %c0_i32_1 = arith.constant 0 : i32
    return %c0_i32, %c0_i32_0 : i32, i32
  }
  func.func @transform_3(%arg0: i32, %arg1: i32) -> (i32, i32) {
    %c0_i32 = arith.constant 0 : i32
    %c0_i32_0 = arith.constant 0 : i32
    %c0_i32_1 = arith.constant 0 : i32
    return %c0_i32, %c0_i32_0 : i32, i32
  }
  func.func @transform_4(%arg0: i32, %arg1: i32) -> (i32, i32) {
    %c1_i32 = arith.constant 1 : i32
    %0 = arith.muli %arg0, %c1_i32 : i32
    %1 = arith.addi %0, %arg1 : i32
    %c0_i32 = arith.constant 0 : i32
    %c0_i32_0 = arith.constant 0 : i32
    return %1, %c0_i32 : i32, i32
  }
  func.func @transform_5(%arg0: i32, %arg1: i32) -> (i32, i32, i32) {
    %c0_i32 = arith.constant 0 : i32
    %c0_i32_0 = arith.constant 0 : i32
    %c0_i32_1 = arith.constant 0 : i32
    return %arg0, %c0_i32, %c0_i32_0 : i32, i32, i32
  }
  func.func @transform_6(%arg0: i32, %arg1: i32) -> (i32, i32, i32) {
    %c0_i32 = arith.constant 0 : i32
    %c0_i32_0 = arith.constant 0 : i32
    %c0_i32_1 = arith.constant 0 : i32
    return %arg0, %c0_i32, %c0_i32_0 : i32, i32, i32
  }
}

module attributes {stable_mosaic.version = 11 : i64} {
  func.func @_conv_bn_stats_kernel(%arg0: i32, %arg1: i32, %arg2: memref<32x128xbf16, #tpu.memory_space<vmem>>, %arg3: memref<128x128xbf16, #tpu.memory_space<vmem>>, %arg4: memref<32x128xbf16, #tpu.memory_space<vmem>>, %arg5: memref<1x1x128xf32, #tpu.memory_space<vmem>>, %arg6: memref<1x1x128xf32, #tpu.memory_space<vmem>>) attributes {dimension_semantics = [#tpu.dimension_semantics<parallel>, #tpu.dimension_semantics<arbitrary>], iteration_bounds = array<i64: 1, 1>, scalar_prefetch = 0 : i64, scratch_operands = 0 : i64, tpu.core_type = #tpu.core_type<tc>, window_params = [{transform_indices = @transform_0, window_bounds = array<i64: 32, 128>}, {pipeline_mode = #tpu.pipeline_mode<synchronous>, transform_indices = @transform_1, window_bounds = array<i64: 128, 128>}, {transform_indices = @transform_2, window_bounds = array<i64: 32, 128>}, {transform_indices = @transform_3, window_bounds = array<i64: 1, 1, 128>}, {transform_indices = @transform_4, window_bounds = array<i64: 1, 1, 128>}]} {
    %c0_i32 = arith.constant 0 : i32
    %0 = arith.cmpi eq, %arg1, %c0_i32 : i32
    %1 = arith.extui %0 : i1 to i32
    %c0_i32_0 = arith.constant 0 : i32
    %2 = arith.cmpi ne, %1, %c0_i32_0 : i32
    scf.if %2 {
      %cst_20 = arith.constant 0.000000e+00 : f32
      %23 = vector.broadcast %cst_20 : f32 to vector<1x1x128xf32>
      %c0_21 = arith.constant 0 : index
      %c0_22 = arith.constant 0 : index
      %c0_23 = arith.constant 0 : index
      %24 = vector.load %arg5[%c0_21, %c0_22, %c0_23] : memref<1x1x128xf32, #tpu.memory_space<vmem>>, vector<1x1x128xf32>
      tpu.vector_store %arg5[%c0_21, %c0_22, %c0_23], %23 {strides = array<i32>} : memref<1x1x128xf32, #tpu.memory_space<vmem>>, vector<1x1x128xf32>,
      %cst_24 = arith.constant 0.000000e+00 : f32
      %25 = vector.broadcast %cst_24 : f32 to vector<1x1x128xf32>
      %c0_25 = arith.constant 0 : index
      %c0_26 = arith.constant 0 : index
      %c0_27 = arith.constant 0 : index
      %26 = vector.load %arg6[%c0_25, %c0_26, %c0_27] : memref<1x1x128xf32, #tpu.memory_space<vmem>>, vector<1x1x128xf32>
      tpu.vector_store %arg6[%c0_25, %c0_26, %c0_27], %25 {strides = array<i32>} : memref<1x1x128xf32, #tpu.memory_space<vmem>>, vector<1x1x128xf32>,
    } else {
    }
    %c0 = arith.constant 0 : index
    %c0_1 = arith.constant 0 : index
    %3 = vector.load %arg2[%c0, %c0_1] : memref<32x128xbf16, #tpu.memory_space<vmem>>, vector<32x128xbf16>
    %4 = arith.extf %3 : vector<32x128xbf16> to vector<32x128xf32>
    %5 = arith.truncf %4 : vector<32x128xf32> to vector<32x128xbf16>
    %c0_2 = arith.constant 0 : index
    %c0_3 = arith.constant 0 : index
    %6 = vector.load %arg3[%c0_2, %c0_3] : memref<128x128xbf16, #tpu.memory_space<vmem>>, vector<128x128xbf16>
    %cst = arith.constant dense<0.000000e+00> : vector<32x128xf32>
    %7 = tpu.matmul %5, %6, %cst {dimension_numbers = #tpu.dot_dimension_numbers<[1], [0], [0], [1], [0, 0, 1, 1], [], []>} : vector<32x128xbf16>, vector<128x128xbf16>, vector<32x128xf32> -> vector<32x128xf32>
    %8 = arith.truncf %7 : vector<32x128xf32> to vector<32x128xbf16>
    %c0_4 = arith.constant 0 : index
    %c0_5 = arith.constant 0 : index
    %9 = vector.load %arg4[%c0_4, %c0_5] : memref<32x128xbf16, #tpu.memory_space<vmem>>, vector<32x128xbf16>
    tpu.vector_store %arg4[%c0_4, %c0_5], %8 {strides = array<i32>} : memref<32x128xbf16, #tpu.memory_space<vmem>>, vector<32x128xbf16>,
    %c0_6 = arith.constant 0 : index
    %c0_7 = arith.constant 0 : index
    %c0_8 = arith.constant 0 : index
    %10 = vector.load %arg5[%c0_6, %c0_7, %c0_8] : memref<1x1x128xf32, #tpu.memory_space<vmem>>, vector<1x1x128xf32>
    %cst_9 = arith.constant dense<0.000000e+00> : vector<128xf32>
    %11 = vector.multi_reduction <add>, %7, %cst_9 [0] : vector<32x128xf32> to vector<128xf32>
    %12 = vector.shape_cast %11 : vector<128xf32> to vector<1x128xf32>
    %13 = vector.shape_cast %12 : vector<1x128xf32> to vector<1x1x128xf32>
    %14 = arith.addf %10, %13 : vector<1x1x128xf32>
    %c0_10 = arith.constant 0 : index
    %c0_11 = arith.constant 0 : index
    %c0_12 = arith.constant 0 : index
    %15 = vector.load %arg5[%c0_10, %c0_11, %c0_12] : memref<1x1x128xf32, #tpu.memory_space<vmem>>, vector<1x1x128xf32>
    tpu.vector_store %arg5[%c0_10, %c0_11, %c0_12], %14 {strides = array<i32>} : memref<1x1x128xf32, #tpu.memory_space<vmem>>, vector<1x1x128xf32>,
    %c0_13 = arith.constant 0 : index
    %c0_14 = arith.constant 0 : index
    %c0_15 = arith.constant 0 : index
    %16 = vector.load %arg6[%c0_13, %c0_14, %c0_15] : memref<1x1x128xf32, #tpu.memory_space<vmem>>, vector<1x1x128xf32>
    %17 = arith.mulf %7, %7 : vector<32x128xf32>
    %cst_16 = arith.constant dense<0.000000e+00> : vector<128xf32>
    %18 = vector.multi_reduction <add>, %17, %cst_16 [0] : vector<32x128xf32> to vector<128xf32>
    %19 = vector.shape_cast %18 : vector<128xf32> to vector<1x128xf32>
    %20 = vector.shape_cast %19 : vector<1x128xf32> to vector<1x1x128xf32>
    %21 = arith.addf %16, %20 : vector<1x1x128xf32>
    %c0_17 = arith.constant 0 : index
    %c0_18 = arith.constant 0 : index
    %c0_19 = arith.constant 0 : index
    %22 = vector.load %arg6[%c0_17, %c0_18, %c0_19] : memref<1x1x128xf32, #tpu.memory_space<vmem>>, vector<1x1x128xf32>
    tpu.vector_store %arg6[%c0_17, %c0_18, %c0_19], %21 {strides = array<i32>} : memref<1x1x128xf32, #tpu.memory_space<vmem>>, vector<1x1x128xf32>,
    return
  }
  func.func @transform_0(%arg0: i32, %arg1: i32) -> (i32, i32) {
    %c1_i32 = arith.constant 1 : i32
    %0 = arith.muli %arg0, %c1_i32 : i32
    %1 = arith.addi %0, %arg1 : i32
    %c0_i32 = arith.constant 0 : i32
    %c0_i32_0 = arith.constant 0 : i32
    return %1, %c0_i32 : i32, i32
  }
  func.func @transform_1(%arg0: i32, %arg1: i32) -> (i32, i32) {
    %c0_i32 = arith.constant 0 : i32
    %c0_i32_0 = arith.constant 0 : i32
    %c0_i32_1 = arith.constant 0 : i32
    return %c0_i32, %c0_i32_0 : i32, i32
  }
  func.func @transform_2(%arg0: i32, %arg1: i32) -> (i32, i32) {
    %c1_i32 = arith.constant 1 : i32
    %0 = arith.muli %arg0, %c1_i32 : i32
    %1 = arith.addi %0, %arg1 : i32
    %c0_i32 = arith.constant 0 : i32
    %c0_i32_0 = arith.constant 0 : i32
    return %1, %c0_i32 : i32, i32
  }
  func.func @transform_3(%arg0: i32, %arg1: i32) -> (i32, i32, i32) {
    %c0_i32 = arith.constant 0 : i32
    %c0_i32_0 = arith.constant 0 : i32
    %c0_i32_1 = arith.constant 0 : i32
    return %arg0, %c0_i32, %c0_i32_0 : i32, i32, i32
  }
  func.func @transform_4(%arg0: i32, %arg1: i32) -> (i32, i32, i32) {
    %c0_i32 = arith.constant 0 : i32
    %c0_i32_0 = arith.constant 0 : i32
    %c0_i32_1 = arith.constant 0 : i32
    return %arg0, %c0_i32, %c0_i32_0 : i32, i32, i32
  }
}

module attributes {stable_mosaic.version = 11 : i64} {
  func.func @_residual_kernel(%arg0: i32, %arg1: memref<32x128xbf16, #tpu.memory_space<vmem>>, %arg2: memref<32x128xbf16, #tpu.memory_space<vmem>>, %arg3: memref<1x128xf32, #tpu.memory_space<vmem>>, %arg4: memref<1x128xf32, #tpu.memory_space<vmem>>, %arg5: memref<32x128xbf16, #tpu.memory_space<vmem>>) attributes {dimension_semantics = [#tpu.dimension_semantics<parallel>], iteration_bounds = array<i64: 1>, scalar_prefetch = 0 : i64, scratch_operands = 0 : i64, tpu.core_type = #tpu.core_type<tc>, window_params = [{transform_indices = @transform_0, window_bounds = array<i64: 32, 128>}, {transform_indices = @transform_1, window_bounds = array<i64: 32, 128>}, {pipeline_mode = #tpu.pipeline_mode<synchronous>, transform_indices = @transform_2, window_bounds = array<i64: 1, 128>}, {pipeline_mode = #tpu.pipeline_mode<synchronous>, transform_indices = @transform_3, window_bounds = array<i64: 1, 128>}, {transform_indices = @transform_4, window_bounds = array<i64: 32, 128>}]} {
    %c0 = arith.constant 0 : index
    %c0_0 = arith.constant 0 : index
    %0 = vector.load %arg1[%c0, %c0_0] : memref<32x128xbf16, #tpu.memory_space<vmem>>, vector<32x128xbf16>
    %1 = arith.extf %0 : vector<32x128xbf16> to vector<32x128xf32>
    %c0_1 = arith.constant 0 : index
    %c0_2 = arith.constant 0 : index
    %2 = vector.load %arg3[%c0_1, %c0_2] : memref<1x128xf32, #tpu.memory_space<vmem>>, vector<1x128xf32>
    %3 = vector.broadcast %2 : vector<1x128xf32> to vector<32x128xf32>
    %4 = arith.mulf %1, %3 : vector<32x128xf32>
    %c0_3 = arith.constant 0 : index
    %c0_4 = arith.constant 0 : index
    %5 = vector.load %arg4[%c0_3, %c0_4] : memref<1x128xf32, #tpu.memory_space<vmem>>, vector<1x128xf32>
    %6 = vector.broadcast %5 : vector<1x128xf32> to vector<32x128xf32>
    %7 = arith.addf %4, %6 : vector<32x128xf32>
    %cst = arith.constant 0.000000e+00 : f32
    %cst_5 = arith.constant 6.000000e+00 : f32
    %8 = vector.broadcast %cst : f32 to vector<32x128xf32>
    %9 = arith.maximumf %8, %7 : vector<32x128xf32>
    %10 = vector.broadcast %cst_5 : f32 to vector<32x128xf32>
    %11 = arith.minimumf %10, %9 : vector<32x128xf32>
    %c0_6 = arith.constant 0 : index
    %c0_7 = arith.constant 0 : index
    %12 = vector.load %arg2[%c0_6, %c0_7] : memref<32x128xbf16, #tpu.memory_space<vmem>>, vector<32x128xbf16>
    %13 = arith.extf %12 : vector<32x128xbf16> to vector<32x128xf32>
    %14 = arith.addf %11, %13 : vector<32x128xf32>
    %cst_8 = arith.constant 0.000000e+00 : f32
    %cst_9 = arith.constant 6.000000e+00 : f32
    %15 = vector.broadcast %cst_8 : f32 to vector<32x128xf32>
    %16 = arith.maximumf %15, %14 : vector<32x128xf32>
    %17 = vector.broadcast %cst_9 : f32 to vector<32x128xf32>
    %18 = arith.minimumf %17, %16 : vector<32x128xf32>
    %19 = arith.truncf %18 : vector<32x128xf32> to vector<32x128xbf16>
    %c0_10 = arith.constant 0 : index
    %c0_11 = arith.constant 0 : index
    %20 = vector.load %arg5[%c0_10, %c0_11] : memref<32x128xbf16, #tpu.memory_space<vmem>>, vector<32x128xbf16>
    tpu.vector_store %arg5[%c0_10, %c0_11], %19 {strides = array<i32>} : memref<32x128xbf16, #tpu.memory_space<vmem>>, vector<32x128xbf16>,
    return
  }
  func.func @transform_0(%arg0: i32) -> (i32, i32) {
    %c0_i32 = arith.constant 0 : i32
    %c0_i32_0 = arith.constant 0 : i32
    return %arg0, %c0_i32 : i32, i32
  }
  func.func @transform_1(%arg0: i32) -> (i32, i32) {
    %c0_i32 = arith.constant 0 : i32
    %c0_i32_0 = arith.constant 0 : i32
    return %arg0, %c0_i32 : i32, i32
  }
  func.func @transform_2(%arg0: i32) -> (i32, i32) {
    %c0_i32 = arith.constant 0 : i32
    %c0_i32_0 = arith.constant 0 : i32
    %c0_i32_1 = arith.constant 0 : i32
    return %c0_i32, %c0_i32_0 : i32, i32
  }
  func.func @transform_3(%arg0: i32) -> (i32, i32) {
    %c0_i32 = arith.constant 0 : i32
    %c0_i32_0 = arith.constant 0 : i32
    %c0_i32_1 = arith.constant 0 : i32
    return %c0_i32, %c0_i32_0 : i32, i32
  }
  func.func @transform_4(%arg0: i32) -> (i32, i32) {
    %c0_i32 = arith.constant 0 : i32
    %c0_i32_0 = arith.constant 0 : i32
    return %arg0, %c0_i32 : i32, i32
  }
}

</mosaic_0001>

<bundles_post_ra>
// kernel: block_forward.7
= control target key start
LH: loop header
LB: loop body
LE: loop exit
PB: predicated region body
PF: predicated region fallthrough
CT: control target
= control target key end

     0   :  { %s225_s0 = inlined_call_operand.vmem [shape: bf16[32,128], index: 0, kind: input, shape index: {}]   ;;  %s226_s1 = inlined_call_operand.vmem [shape: bf16[32,128], index: 1, kind: input, shape index: {}]   ;;  %s227_s2 = inlined_call_operand.vmem [shape: f32[1,128], index: 2, kind: input, shape index: {}]   ;;  %s228_s3 = inlined_call_operand.vmem [shape: f32[1,128], index: 3, kind: input, shape index: {}]   ;;  %s229_s4 = inlined_call_operand.hbm [shape: bf16[32,128], index: 4, kind: output, shape index: {}]  }
   0x1   :  { %v123_v0 = vld [vmem:[%s225_s0] sm:$0xff]   ;;  %v148_v4 = vld [vmem:[%s225_s0 + $0x8] sm:$0xff]  }
   0x2   :  { %v112_v1 = vld [vmem:[%s227_s2] ss:$0 sm:$0xff]  ;;  %v124_v2 = vunpack.c.l.bf16 %v123_v0  ;;  %v125_v3 = vunpack.c.h.bf16 %v123_v0  ;;  %v128_v6 = vunpack.c.l.bf16 %v148_v4  ;;  %v129_v7 = vunpack.c.h.bf16 %v148_v4 }
   0x3   :  { %v113_v5 = vld [vmem:[%s228_s3] ss:$0 sm:$0xff] }
   0x4   :  { %9 = vsyncpa [#allocation3], 0  ;;  %v33_v8 = vmul.f32 %v124_v2, %v112_v1  ;;  %v34_v9 = vmul.f32 %v125_v3, %v112_v1  ;;  %v131_v10 = vld [vmem:[%s226_s1] sm:$0xff]   ;;  %v35_v11 = vmul.f32 %v128_v6, %v112_v1  ;;  %v36_v12 = vmul.f32 %v129_v7, %v112_v1  ;;  %v149_v15 = vld [vmem:[%s226_s1 + $0x8] sm:$0xff]   ;;  %s176_s0 = smov [#allocation2]  }
   0x5   :  { %v132_v20 = vunpack.c.l.bf16 %v131_v10  ;;  %v133_v21 = vunpack.c.h.bf16 %v131_v10  ;;  %v136_v24 = vunpack.c.l.bf16 %v149_v15  ;;  %v137_v25 = vunpack.c.h.bf16 %v149_v15  ;;  %s101_s1 = sshll.u32 %s176_s0, 4  ;;  %s102_s1 = int_to_ptr.vmem [resolvable:$true] %s101_s1 }
   0x6   :  { %v44_v13 = vadd.f32 %v113_v5, %v33_v8  ;;  %v45_v14 = vadd.f32 %v113_v5, %v34_v9  ;;  %v46_v16 = vadd.f32 %v113_v5, %v35_v11  ;;  %v47_v17 = vadd.f32 %v113_v5, %v36_v12  ;;  %s154_s3 = scalar_lea.vmem %s102_s1, 256  ;;  %p159_p1 = scmp.lt.s32.totalorder %s102_s1, %s102_s1 }
   0x7   :  { %p155_p0 = scmp.ne.s32.totalorder %s102_s1, %s154_s3  ;;  %p160_p2 = scmp.lt.s32.totalorder %s154_s3, %s154_s3 }
   0x8   :  { %v48_v18 = vmax.f32 %v44_v13, 0.0  ;;  %v49_v19 = vmax.f32 %v45_v14, 0.0  ;;  %v50_v22 = vmax.f32 %v46_v16, 0.0  ;;  %v51_v23 = vmax.f32 %v47_v17, 0.0 }
   0x9   :  { %p161_p3 = por %p160_p2, %p159_p1 }
   0xa   :  { %v52_v26 = vmin.f32 %v48_v18, 6.0  ;;  %v53_v27 = vmin.f32 %v49_v19, 6.0  ;;  %v54_v28 = vmin.f32 %v50_v22, 6.0  ;;  %v55_v29 = vmin.f32 %v51_v23, 6.0 }
   0xb   :  { %p162_p4 = pnand %p161_p3, %p155_p0 }
   0xc   :  { %v64_v30 = vadd.f32 %v132_v20, %v52_v26  ;;  %v65_v31 = vadd.f32 %v133_v21, %v53_v27  ;;  %v66_v32 = vadd.f32 %v136_v24, %v54_v28  ;;  %v67_v33 = vadd.f32 %v137_v25, %v55_v29 }
   0xe   :  { %v68_v34 = vmax.f32 %v64_v30, 0.0  ;;  %v69_v35 = vmax.f32 %v65_v31, 0.0  ;;  %v70_v36 = vmax.f32 %v66_v32, 0.0  ;;  %v71_v37 = vmax.f32 %v67_v33, 0.0 }
  0x10   :  { %v72_v38 = vmin.f32 %v68_v34, 6.0  ;;  %v73_v39 = vmin.f32 %v69_v35, 6.0  ;;  %v74_v40 = vmin.f32 %v70_v36, 6.0  ;;  %v75_v41 = vmin.f32 %v71_v37, 6.0 }
  0x12   :  { %v141_v42 = vpack.c.bf16 %v73_v39, %v72_v38  ;;  %v146_v43 = vpack.c.bf16 %v75_v41, %v74_v40 }
  0x14   :  { %142 = vst [vmem:[#allocation2] sm:$0xff] %v141_v42   ;;  %150 = vst [vmem:[#allocation2 + $0x8] sm:$0xff] %v146_v43  }
  0x15   :  { %165 = shalt.err (!%p162_p4)
}
  0x16   :  { %s177_s26 = smov 64   ;;  %s178_s27 = smov 4  }
  0x17   :  { %107 = dma.vmem_to_hbm [thread:$0]  %s102_s1, 256, %s229_s4, [#allocation3], %s177_s26, %s177_s26, %s178_s27  }
  0x18   :  { %174 = dma.done.wait [#allocation3], 256  }
  0x19   :  { %175 = vsyncadd [#allocation3], 4294967040 }
  0x1a   :  { %111 = vsyncpa [#allocation3], 1 }

// kernel: block_forward.4
= control target key start
LH: loop header
LB: loop body
LE: loop exit
PB: predicated region body
PF: predicated region fallthrough
CT: control target
= control target key end

     0   :  { %v344_v10 = vmov 0.0   ;;  %s424_s1 = inlined_call_operand.vmem [shape: bf16[128,128], index: 1, kind: input, shape index: {}]   ;;  %s425_s0 = inlined_call_operand.vmem [shape: bf16[32,128], index: 0, kind: input, shape index: {}]   ;;  %s426_s3 = inlined_call_operand.vmem [shape: f32[1,1,128], index: 3, kind: output, shape index: {1}]   ;;  %s427_s4 = inlined_call_operand.vmem [shape: f32[1,1,128], index: 4, kind: output, shape index: {2}]   ;;  %s428_s2 = inlined_call_operand.vmem [shape: bf16[32,128], index: 2, kind: output, shape index: {0}]  }
   0x1   :  { %v334_v0 = vld [vmem:[%s424_s1 + $0x38] sm:$0xff]   ;;  %v335_v1 = vld [vmem:[%s424_s1 + $0x30] sm:$0xff]   ;;  %v336_v2 = vld [vmem:[%s424_s1 + $0x28] sm:$0xff]   ;;  %55 = vst [vmem:[%s426_s3] sm:$0x1] %v344_v10 }
   0x2   :  { %313 = vmatprep.subr.bf16.mxu0 %v334_v0  ;;  %v337_v3 = vld [vmem:[%s424_s1 + $0x20] sm:$0xff]   ;;  %v338_v5 = vld [vmem:[%s424_s1 + $0x18] sm:$0xff]   ;;  %v339_v6 = vld [vmem:[%s424_s1 + $0x10] sm:$0xff]   ;;  %56 = vst [vmem:[%s427_s4] sm:$0x1] %v344_v10 }
   0x3   :  { %314 = vmatpush3.bf16.msra.mxu0 %v334_v0  ;;  %v342_v4 = vld [vmem:[%s425_s0] sm:$0xff]   ;;  %v340_v7 = vld [vmem:[%s424_s1 + $0x8] sm:$0xff]  }
   0x4   :  { %315 = vmatprep.subr.bf16.mxu0 %v335_v1  ;;  %329 = vmatprep.mubr.bf16.mxu0 %v342_v4  ;;  %v341_v8 = vld [vmem:[%s424_s1] sm:$0xff]   ;;  %v343_v9 = vld [vmem:[%s425_s0 + $0x8] sm:$0xff]  }
   0x7   :  { %316 = vmatpush3.bf16.msra.mxu0 %v335_v1 }
   0x8   :  { %317 = vmatprep.subr.bf16.mxu0 %v336_v2  ;;  %v206_v36 = vld [vmem:[%s426_s3] sm:$0x1] }
   0x9   :  { %v218_v39 = vld [vmem:[%s427_s4] sm:$0x1] }
   0xb   :  { %318 = vmatpush3.bf16.msra.mxu0 %v336_v2 }
   0xc   :  { %319 = vmatprep.subr.bf16.mxu0 %v337_v3 }
   0xf   :  { %320 = vmatpush3.bf16.msra.mxu0 %v337_v3 }
  0x10   :  { %321 = vmatprep.subr.bf16.mxu0 %v338_v5 }
  0x13   :  { %322 = vmatpush3.bf16.msra.mxu0 %v338_v5 }
  0x14   :  { %323 = vmatprep.subr.bf16.mxu0 %v339_v6 }
  0x17   :  { %324 = vmatpush3.bf16.msra.mxu0 %v339_v6 }
  0x18   :  { %325 = vmatprep.subr.bf16.mxu0 %v340_v7 }
  0x1b   :  { %326 = vmatpush3.bf16.msra.mxu0 %v340_v7 }
  0x1c   :  { %327 = vmatprep.subr.bf16.mxu0 %v341_v8 }
  0x1f   :  { %328 = vmatpush3.bf16.msra.mxu0 %v341_v8 }
  0x22   :  { %330 = vmatmul.mubr.bf16.vlgmr.msra.gmra.mxu0 %v343_v9 }
  0xe2   :  { %v331_v11 = vpop.f32.mrf.mxu0 }
  0xe3   :  { %v221_v20 = vmul.f32 %v331_v11, %v331_v11 }
  0xe4   :  { %v171_v12 = vpop.f32.mrf.mxu0 }
  0xe5   :  { %v219_v16 = vmul.f32 %v171_v12, %v171_v12 }
  0xe6   :  { %v332_v13 = vpop.f32.mrf.mxu0 }
  0xe7   :  { %v300_v14 = vpack.c.bf16 %v332_v13, %v331_v11  ;;  %v222_v23 = vmul.f32 %v332_v13, %v332_v13 }
  0xe8   :  { %v174_v15 = vpop.f32.mrf.mxu0 }
  0xe9   :  { %v295_v17 = vpack.c.bf16 %v174_v15, %v171_v12  ;;  %302 = vst [vmem:[%s428_s2 + $0x8] sm:$0xff] %v300_v14   ;;  %v207_v18 = vadd.f32 %v174_v15, %v171_v12  ;;  %v220_v19 = vmul.f32 %v174_v15, %v174_v15 }
  0xeb   :  { %296 = vst [vmem:[%s428_s2] sm:$0xff] %v295_v17   ;;  %v208_v21 = vadd.f32 %v331_v11, %v207_v18  ;;  %v223_v22 = vadd.f32 %v220_v19, %v219_v16 }
  0xed   :  { %v209_v24 = vadd.f32 %v332_v13, %v208_v21  ;;  %v224_v25 = vadd.f32 %v223_v22, %v221_v20 }
  0xef   :  { %v210_v26 = vrot.slane %v209_v24, 4  ;;  %v225_v27 = vadd.f32 %v224_v25, %v222_v23 }
  0xf1   :  { %v211_v28 = vadd.f32 %v210_v26, %v209_v24  ;;  %v226_v29 = vrot.slane %v225_v27, 4 }
  0xf3   :  { %v212_v30 = vrot.slane %v211_v28, 2  ;;  %v227_v31 = vadd.f32 %v226_v29, %v225_v27 }
  0xf5   :  { %v213_v32 = vadd.f32 %v212_v30, %v211_v28  ;;  %v228_v33 = vrot.slane %v227_v31, 2 }
  0xf7   :  { %v214_v34 = vrot.slane %v213_v32, 1  ;;  %v229_v35 = vadd.f32 %v228_v33, %v227_v31 }
  0xf9   :  { %v215_v37 = vadd.f32 %v214_v34, %v213_v32  ;;  %v230_v38 = vrot.slane %v229_v35, 1 }
  0xfb   :  { %v216_v40 = vadd.f32 %v215_v37, %v206_v36  ;;  %v231_v41 = vadd.f32 %v230_v38, %v229_v35 }
  0xfd   :  { %217 = vst [vmem:[%s426_s3] sm:$0x1] %v216_v40  ;;  %v232_v42 = vadd.f32 %v231_v41, %v218_v39 }
  0xff   :  { %233 = vst [vmem:[%s427_s4] sm:$0x1] %v232_v42 }

// kernel: block_forward.5
= control target key start
LH: loop header
LB: loop body
LE: loop exit
PB: predicated region body
PF: predicated region fallthrough
CT: control target
= control target key end

     0   :  { %v381_v34 = vmov 0.0   ;;  %s477_s3 = inlined_call_operand.vmem [shape: bf16[128,128], index: 3, kind: input, shape index: {}]   ;;  %s478_s0 = inlined_call_operand.vmem [shape: bf16[32,128], index: 0, kind: input, shape index: {}]   ;;  %s479_s1 = inlined_call_operand.vmem [shape: f32[1,128], index: 1, kind: input, shape index: {}]   ;;  %s480_s2 = inlined_call_operand.vmem [shape: f32[1,128], index: 2, kind: input, shape index: {}]   ;;  %s481_s5 = inlined_call_operand.vmem [shape: f32[1,1,128], index: 5, kind: output, shape index: {1}]   ;;  %s482_s6 = inlined_call_operand.vmem [shape: f32[1,1,128], index: 6, kind: output, shape index: {2}]   ;;  %s483_s4 = inlined_call_operand.vmem [shape: bf16[32,128], index: 4, kind: output, shape index: {0}]  }
   0x1   :  { %v373_v0 = vld [vmem:[%s477_s3 + $0x38] sm:$0xff]   ;;  %v374_v1 = vld [vmem:[%s477_s3 + $0x30] sm:$0xff]   ;;  %v375_v2 = vld [vmem:[%s477_s3 + $0x28] sm:$0xff]   ;;  %61 = vst [vmem:[%s481_s5] sm:$0x1] %v381_v34 }
   0x2   :  { %352 = vmatprep.subr.bf16.mxu0 %v373_v0  ;;  %v376_v3 = vld [vmem:[%s477_s3 + $0x20] sm:$0xff]   ;;  %v340_v5 = vld [vmem:[%s478_s0 + $0x8] sm:$0xff]   ;;  %v377_v14 = vld [vmem:[%s477_s3 + $0x18] sm:$0xff]   ;;  %62 = vst [vmem:[%s482_s6] sm:$0x1] %v381_v34 }
   0x3   :  { %353 = vmatpush3.bf16.msra.mxu0 %v373_v0  ;;  %v323_v4 = vld [vmem:[%s478_s0] sm:$0xff]   ;;  %v328_v10 = vunpack.c.l.bf16 %v340_v5  ;;  %v329_v11 = vunpack.c.h.bf16 %v340_v5  ;;  %v378_v21 = vld [vmem:[%s477_s3 + $0x10] sm:$0xff]   ;;  %v379_v27 = vld [vmem:[%s477_s3 + $0x8] sm:$0xff]  }
   0x4   :  { %354 = vmatprep.subr.bf16.mxu0 %v374_v1  ;;  %v304_v6 = vld [vmem:[%s479_s1] ss:$0 sm:$0xff]  ;;  %v324_v7 = vunpack.c.l.bf16 %v323_v4  ;;  %v325_v8 = vunpack.c.h.bf16 %v323_v4 }
   0x5   :  { %v305_v9 = vld [vmem:[%s480_s2] ss:$0 sm:$0xff]  ;;  %v80_v17 = vmul.f32 %v328_v10, %v304_v6  ;;  %v81_v18 = vmul.f32 %v329_v11, %v304_v6 }
   0x6   :  { %v78_v12 = vmul.f32 %v324_v7, %v304_v6  ;;  %v79_v13 = vmul.f32 %v325_v8, %v304_v6  ;;  %v380_v30 = vld [vmem:[%s477_s3] sm:$0xff]  }
   0x7   :  { %355 = vmatpush3.bf16.msra.mxu0 %v374_v1  ;;  %v91_v24 = vadd.f32 %v305_v9, %v80_v17  ;;  %v92_v25 = vadd.f32 %v305_v9, %v81_v18 }
   0x8   :  { %356 = vmatprep.subr.bf16.mxu0 %v375_v2  ;;  %v89_v15 = vadd.f32 %v305_v9, %v78_v12  ;;  %v90_v16 = vadd.f32 %v305_v9, %v79_v13  ;;  %v236_v60 = vld [vmem:[%s481_s5] sm:$0x1] }
   0x9   :  { %v95_v28 = vmax.f32 %v91_v24, 0.0  ;;  %v96_v29 = vmax.f32 %v92_v25, 0.0  ;;  %v248_v63 = vld [vmem:[%s482_s6] sm:$0x1] }
   0xa   :  { %v93_v19 = vmax.f32 %v89_v15, 0.0  ;;  %v94_v20 = vmax.f32 %v90_v16, 0.0 }
   0xb   :  { %357 = vmatpush3.bf16.msra.mxu0 %v375_v2  ;;  %v99_v31 = vmin.f32 %v95_v28, 6.0  ;;  %v100_v32 = vmin.f32 %v96_v29, 6.0 }
   0xc   :  { %358 = vmatprep.subr.bf16.mxu0 %v376_v3  ;;  %v97_v22 = vmin.f32 %v93_v19, 6.0  ;;  %v98_v23 = vmin.f32 %v94_v20, 6.0 }
   0xd   :  { %v102_v33 = vpack.c.bf16 %v100_v32, %v99_v31 }
   0xe   :  { %v101_v26 = vpack.c.bf16 %v98_v23, %v97_v22 }
   0xf   :  { %359 = vmatpush3.bf16.msra.mxu0 %v376_v3 }
  0x10   :  { %360 = vmatprep.subr.bf16.mxu0 %v377_v14  ;;  %368 = vmatprep.mubr.bf16.mxu0 %v101_v26 }
  0x13   :  { %361 = vmatpush3.bf16.msra.mxu0 %v377_v14 }
  0x14   :  { %362 = vmatprep.subr.bf16.mxu0 %v378_v21 }
  0x17   :  { %363 = vmatpush3.bf16.msra.mxu0 %v378_v21 }
  0x18   :  { %364 = vmatprep.subr.bf16.mxu0 %v379_v27 }
  0x1b   :  { %365 = vmatpush3.bf16.msra.mxu0 %v379_v27 }
  0x1c   :  { %366 = vmatprep.subr.bf16.mxu0 %v380_v30 }
  0x1f   :  { %367 = vmatpush3.bf16.msra.mxu0 %v380_v30 }
  0x22   :  { %369 = vmatmul.mubr.bf16.vlgmr.msra.gmra.mxu0 %v102_v33 }
  0xe2   :  { %v370_v35 = vpop.f32.mrf.mxu0 }
  0xe3   :  { %v251_v44 = vmul.f32 %v370_v35, %v370_v35 }
  0xe4   :  { %v201_v36 = vpop.f32.mrf.mxu0 }
  0xe5   :  { %v249_v40 = vmul.f32 %v201_v36, %v201_v36 }
  0xe6   :  { %v371_v37 = vpop.f32.mrf.mxu0 }
  0xe7   :  { %v338_v38 = vpack.c.bf16 %v371_v37, %v370_v35  ;;  %v252_v47 = vmul.f32 %v371_v37, %v371_v37 }
  0xe8   :  { %v204_v39 = vpop.f32.mrf.mxu0 }
  0xe9   :  { %v333_v41 = vpack.c.bf16 %v204_v39, %v201_v36  ;;  %341 = vst [vmem:[%s483_s4 + $0x8] sm:$0xff] %v338_v38   ;;  %v237_v42 = vadd.f32 %v204_v39, %v201_v36  ;;  %v250_v43 = vmul.f32 %v204_v39, %v204_v39 }
  0xeb   :  { %334 = vst [vmem:[%s483_s4] sm:$0xff] %v333_v41   ;;  %v238_v45 = vadd.f32 %v370_v35, %v237_v42  ;;  %v253_v46 = vadd.f32 %v250_v43, %v249_v40 }
  0xed   :  { %v239_v48 = vadd.f32 %v371_v37, %v238_v45  ;;  %v254_v49 = vadd.f32 %v253_v46, %v251_v44 }
  0xef   :  { %v240_v50 = vrot.slane %v239_v48, 4  ;;  %v255_v51 = vadd.f32 %v254_v49, %v252_v47 }
  0xf1   :  { %v241_v52 = vadd.f32 %v240_v50, %v239_v48  ;;  %v256_v53 = vrot.slane %v255_v51, 4 }
  0xf3   :  { %v242_v54 = vrot.slane %v241_v52, 2  ;;  %v257_v55 = vadd.f32 %v256_v53, %v255_v51 }
  0xf5   :  { %v243_v56 = vadd.f32 %v242_v54, %v241_v52  ;;  %v258_v57 = vrot.slane %v257_v55, 2 }
  0xf7   :  { %v244_v58 = vrot.slane %v243_v56, 1  ;;  %v259_v59 = vadd.f32 %v258_v57, %v257_v55 }
  0xf9   :  { %v245_v61 = vadd.f32 %v244_v58, %v243_v56  ;;  %v260_v62 = vrot.slane %v259_v59, 1 }
  0xfb   :  { %v246_v0 = vadd.f32 %v245_v61, %v236_v60  ;;  %v261_v1 = vadd.f32 %v260_v62, %v259_v59 }
  0xfd   :  { %247 = vst [vmem:[%s481_s5] sm:$0x1] %v246_v0  ;;  %v262_v2 = vadd.f32 %v261_v1, %v248_v63 }
  0xff   :  { %263 = vst [vmem:[%s482_s6] sm:$0x1] %v262_v2 }

</bundles_post_ra>
